<compile_context>
chip_gen: v7x
topology: tpu7x:2x2x1
jax: 0.10.0
libtpu: 0.0.40
codegen_flags: <defaults>
</compile_context>

<pallas_src>
import jax
import jax.numpy as jnp
from jax.experimental import pallas as pl
from jax.experimental.pallas import tpu as pltpu


def _patch_embed_kernel(x_ref, w_ref, b_ref, o_ref):
    # x_ref: (TM, KP) compute_dtype   w_ref: (KP, DP) compute_dtype (resident)
    # b_ref: (1, DP) f32 (resident)   o_ref: (TM, DP) out_dtype
    acc = jnp.dot(x_ref[...], w_ref[...], preferred_element_type=jnp.float32)
    o_ref[...] = (acc + b_ref[...]).astype(o_ref.dtype)


def _round_up(a, b):
    return ((a + b - 1) // b) * b


def patch_embed(x, weight, bias, patch_size, *, flatten=True,
                compute_dtype=jnp.bfloat16, out_dtype=None, tm=1024):
    """ViT patch embedding.

    x: (B, C, H, W) NCHW.  weight: (D, C, ph, pw) Conv2d weight.  bias: (D,).
    compute_dtype: MXU input dtype (use jnp.float32 for bit-parity with an f32
    PyTorch conv).  out_dtype: defaults to compute_dtype (bf16) -- the op is
    HBM-bound on v6e/v7x and downstream transformer blocks accept bf16; pass
    jnp.float32 explicitly if the consumer needs it.
    tm: M-tile.  Default 1024 fits the default scoped VMEM on v5e/v6e/v7x with
    bf16 I/O; going to 2048 is fine on v6e/v7x but needs vmem_limit_bytes (or
    f32-out avoidance) on v5e.
    """
    B, C, H, W = x.shape
    ph, pw = patch_size
    assert H % ph == 0 and W % pw == 0, \
        f"Input ({H}x{W}) not divisible by patch size ({ph}x{pw})."
    D = weight.shape[0]
    Hp, Wp = H // ph, W // pw
    num_patches = Hp * Wp
    K = C * ph * pw
    M = B * num_patches
    out_dtype = compute_dtype if out_dtype is None else out_dtype

    # --- layout glue: extract non-overlapping patches, K ordered as (c, ph, pw)
    #     to match the Conv2d weight layout.  One fused XLA transpose pass; the
    #     compute-dtype cast (and any K/M zero-pad below) fuses into it.
    xp = x.reshape(B, C, Hp, ph, Wp, pw)
    xp = jnp.transpose(xp, (0, 2, 4, 1, 3, 5)).reshape(M, K).astype(compute_dtype)
    wk = weight.reshape(D, K).T.astype(compute_dtype)        # (K, D)
    bk = bias.reshape(1, D).astype(jnp.float32)              # (1, D)

    # --- lane-dense blocks: pad K and D to multiples of 128 (full MXU passes,
    #     unmasked vst on the output).  Standard ViT (K=D=768) needs no pad.
    KP = _round_up(K, 128)
    if KP != K:
        xp = jnp.pad(xp, ((0, 0), (0, KP - K)))
        wk = jnp.pad(wk, ((0, KP - K), (0, 0)))
    DP = _round_up(D, 128)
    if DP != D:
        wk = jnp.pad(wk, ((0, 0), (0, DP - D)))
        bk = jnp.pad(bk, ((0, 0), (0, DP - D)))

    # --- M tiling:
    #   * 16-aligned (bf16 sublane packing),
    #   * clamped to ceil(M/2) so the grid has >=2 steps whenever M allows it
    #     (both v7x TensorCores get work via the "parallel" axis),
    #   * when possible pick a tile that divides M exactly -> no M pad, no
    #     post-kernel de-pad copy (zero-copy epilogue for standard ViT shapes).
    TM = min(tm, _round_up(-(-M // 2), 16))
    if M % TM != 0 and M % 16 == 0:
        cand = (TM // 16) * 16
        while cand >= 16 and M % cand != 0:
            cand -= 16
        if cand >= 16:
            TM = cand
    Mp = _round_up(M, TM)
    if Mp != M:
        xp = jnp.pad(xp, ((0, Mp - M), (0, 0)))

    # VMEM budget per step (TM=1024, K=DP=768, bf16 in/out):
    #   x 2*TM*KP*2B (3 MiB) + out 2*TM*DP*2B (3 MiB) + w KP*DP*2B (1.1 MiB)
    #   + bias  ~= 7.3 MiB  << 16 MiB (v5e) / 32 MiB (v6e, v7x) scoped defaults.
    cost = pl.CostEstimate(
        flops=2 * M * K * D,
        transcendentals=0,
        bytes_accessed=(M * K * jnp.dtype(compute_dtype).itemsize
                        + K * D * jnp.dtype(compute_dtype).itemsize
                        + D * 4
                        + M * D * jnp.dtype(out_dtype).itemsize),
    )

    out = pl.pallas_call(
        _patch_embed_kernel,
        out_shape=jax.ShapeDtypeStruct((Mp, DP), out_dtype),
        grid_spec=pltpu.PrefetchScalarGridSpec(
            num_scalar_prefetch=0,
            grid=(Mp // TM,),
            in_specs=[
                pl.BlockSpec((TM, KP), lambda i: (i, 0)),   # streamed, double-buffered
                pl.BlockSpec((KP, DP), lambda i: (0, 0)),   # resident weight
                pl.BlockSpec((1, DP), lambda i: (0, 0)),    # resident bias
            ],
            out_specs=pl.BlockSpec((TM, DP), lambda i: (i, 0)),
        ),
        compiler_params=pltpu.CompilerParams(
            # Disjoint output tiles along M -> shard across the two
            # TensorCores on v7x; neutral on single-TC v5e/v6e.
            dimension_semantics=("parallel",),
        ),
        cost_estimate=cost,
    )(xp, wk, bk)

    # De-pad only when actually padded (identity for aligned ViT shapes).
    if Mp != M or DP != D:
        out = out[:M, :D]
    if flatten:
        return out.reshape(B, num_patches, D)   # 'B C H W -> B (H W) C'
    else:
        return out.reshape(B, Hp, Wp, D)        # 'B C H W -> B H W C' (NHWC per spec)


if __name__ == "__main__":
    # Small, consistent shapes: img 16x16, patch 8 -> 2x2 = 4 patches, K=256.
    B, C, H, W = 2, 4, 16, 16
    patch = (8, 8)
    embed_dim = 32

    key = jax.random.PRNGKey(0)
    kx, kw, kb = jax.random.split(key, 3)

    x = jax.random.normal(kx, (B, C, H, W), dtype=jnp.float32)
    # Deterministic synthetic conv parameters (shapes match nn.Conv2d(C, D, 8, 8)).
    fan_in = C * patch[0] * patch[1]
    weight = jax.random.normal(kw, (embed_dim, C, patch[0], patch[1]),
                               dtype=jnp.float32) * (1.0 / fan_in) ** 0.5
    bias = jax.random.normal(kb, (embed_dim,), dtype=jnp.float32) * 0.01

    run = jax.jit(lambda a, w, b: patch_embed(a, w, b, patch, flatten=True))
    out = jax.block_until_ready(run(x, weight, bias))

    # Reference: the exact conv the PyTorch module performs (f32).
    ref = jax.lax.conv_general_dilated(
        x, weight, window_strides=patch, padding="VALID",
        dimension_numbers=("NCHW", "OIHW", "NCHW"),
    ) + bias.reshape(1, embed_dim, 1, 1)
    Hp, Wp = H // patch[0], W // patch[1]
    ref = jnp.transpose(ref.reshape(B, embed_dim, Hp * Wp), (0, 2, 1))

    assert out.shape == (B, Hp * Wp, embed_dim)
    # bf16 inputs/outputs with f32 accumulation -> loose tolerance vs f32 ref.
    max_err = float(jnp.max(jnp.abs(out.astype(jnp.float32) - ref)))
    assert max_err < 1e-1, max_err

    # flatten=False branch: spec returns 'B H W C' (NHWC).
    run_nf = jax.jit(lambda a, w, b: patch_embed(a, w, b, patch, flatten=False))
    out_nf = jax.block_until_ready(run_nf(x, weight, bias))
    assert out_nf.shape == (B, Hp, Wp, embed_dim)

    print("KERNEL_OK")
</pallas_src>

<mosaic_0001>
module attributes {stable_mosaic.version = 11 : i64} {
  func.func @_patch_embed_kernel(%arg0: i32, %arg1: memref<16x256xbf16, #tpu.memory_space<vmem>>, %arg2: memref<256x128xbf16, #tpu.memory_space<vmem>>, %arg3: memref<1x128xf32, #tpu.memory_space<vmem>>, %arg4: memref<16x128xbf16, #tpu.memory_space<vmem>>) attributes {dimension_semantics = [#tpu.dimension_semantics<parallel>], iteration_bounds = array<i64: 1>, scalar_prefetch = 0 : i64, scratch_operands = 0 : i64, tpu.core_type = #tpu.core_type<tc>, window_params = [{transform_indices = @transform_0, window_bounds = array<i64: 16, 256>}, {pipeline_mode = #tpu.pipeline_mode<synchronous>, transform_indices = @transform_1, window_bounds = array<i64: 256, 128>}, {pipeline_mode = #tpu.pipeline_mode<synchronous>, transform_indices = @transform_2, window_bounds = array<i64: 1, 128>}, {transform_indices = @transform_3, window_bounds = array<i64: 16, 128>}]} {
    %c0 = arith.constant 0 : index
    %c0_0 = arith.constant 0 : index
    %0 = vector.load %arg1[%c0, %c0_0] : memref<16x256xbf16, #tpu.memory_space<vmem>>, vector<16x256xbf16>
    %c0_1 = arith.constant 0 : index
    %c0_2 = arith.constant 0 : index
    %1 = vector.load %arg2[%c0_1, %c0_2] : memref<256x128xbf16, #tpu.memory_space<vmem>>, vector<256x128xbf16>
    %cst = arith.constant dense<0.000000e+00> : vector<16x128xf32>
    %2 = tpu.matmul %0, %1, %cst {dimension_numbers = #tpu.dot_dimension_numbers<[1], [0], [0], [1], [0, 0, 1, 1], [], []>} : vector<16x256xbf16>, vector<256x128xbf16>, vector<16x128xf32> -> vector<16x128xf32>
    %c0_3 = arith.constant 0 : index
    %c0_4 = arith.constant 0 : index
    %3 = vector.load %arg3[%c0_3, %c0_4] : memref<1x128xf32, #tpu.memory_space<vmem>>, vector<1x128xf32>
    %4 = vector.broadcast %3 : vector<1x128xf32> to vector<16x128xf32>
    %5 = arith.addf %2, %4 : vector<16x128xf32>
    %6 = arith.truncf %5 : vector<16x128xf32> to vector<16x128xbf16>
    %c0_5 = arith.constant 0 : index
    %c0_6 = arith.constant 0 : index
    %7 = vector.load %arg4[%c0_5, %c0_6] : memref<16x128xbf16, #tpu.memory_space<vmem>>, vector<16x128xbf16>
    tpu.vector_store %arg4[%c0_5, %c0_6], %6 {strides = array<i32>} : memref<16x128xbf16, #tpu.memory_space<vmem>>, vector<16x128xbf16>,
    return
  }
  func.func @transform_0(%arg0: i32) -> (i32, i32) {
    %c0_i32 = arith.constant 0 : i32
    %c0_i32_0 = arith.constant 0 : i32
    return %arg0, %c0_i32 : i32, i32
  }
  func.func @transform_1(%arg0: i32) -> (i32, i32) {
    %c0_i32 = arith.constant 0 : i32
    %c0_i32_0 = arith.constant 0 : i32
    %c0_i32_1 = arith.constant 0 : i32
    return %c0_i32, %c0_i32_0 : i32, i32
  }
  func.func @transform_2(%arg0: i32) -> (i32, i32) {
    %c0_i32 = arith.constant 0 : i32
    %c0_i32_0 = arith.constant 0 : i32
    %c0_i32_1 = arith.constant 0 : i32
    return %c0_i32, %c0_i32_0 : i32, i32
  }
  func.func @transform_3(%arg0: i32) -> (i32, i32) {
    %c0_i32 = arith.constant 0 : i32
    %c0_i32_0 = arith.constant 0 : i32
    return %arg0, %c0_i32 : i32, i32
  }
}

</mosaic_0001>

<bundles_post_ra>
// kernel: _lambda_.1
= control target key start
LH: loop header
LB: loop body
LE: loop exit
PB: predicated region body
PF: predicated region fallthrough
CT: control target
= control target key end

     0   :  { %s366_s1 = inlined_call_operand.vmem [shape: bf16[256,128], index: 1, kind: input, shape index: {}]   ;;  %s367_s0 = inlined_call_operand.vmem [shape: bf16[16,256], index: 0, kind: input, shape index: {}]   ;;  %s368_s2 = inlined_call_operand.vmem [shape: f32[1,128], index: 2, kind: input, shape index: {}]   ;;  %s369_s3 = inlined_call_operand.vmem [shape: bf16[16,128], index: 3, kind: output, shape index: {}]  }
   0x1   :  { %v267_v0 = vld [vmem:[%s366_s1 + $0x40] sm:$0xff]   ;;  %v269_v2 = vld [vmem:[%s366_s1 + $0x48] sm:$0xff]   ;;  %v271_v4 = vld [vmem:[%s366_s1 + $0x50] sm:$0xff]  }
   0x2   :  { %v268_v1 = vld [vmem:[%s366_s1] sm:$0xff]   ;;  %245 = vmatprep.subr.bf16.mxu0 %v267_v0  ;;  %v270_v3 = vld [vmem:[%s366_s1 + $0x8] sm:$0xff]   ;;  %v272_v5 = vld [vmem:[%s366_s1 + $0x10] sm:$0xff]  }
   0x3   :  { %246 = vmatpush3.bf16.msra.mxu0 %v268_v1  ;;  %v273_v6 = vld [vmem:[%s366_s1 + $0x58] sm:$0xff]   ;;  %v275_v8 = vld [vmem:[%s366_s1 + $0x60] sm:$0xff]   ;;  %v277_v10 = vld [vmem:[%s366_s1 + $0x68] sm:$0xff]  }
   0x4   :  { %247 = vmatprep.subr.bf16.mxu0 %v269_v2  ;;  %v274_v7 = vld [vmem:[%s366_s1 + $0x18] sm:$0xff]   ;;  %v276_v9 = vld [vmem:[%s366_s1 + $0x20] sm:$0xff]   ;;  %v278_v12 = vld [vmem:[%s366_s1 + $0x28] sm:$0xff]  }
   0x5   :  { %v285_v11 = vld [vmem:[%s367_s0 + $0x4] ss:$8 sps:$4 sm:$0xff]   ;;  %v279_v13 = vld [vmem:[%s366_s1 + $0x70] sm:$0xff]   ;;  %v281_v15 = vld [vmem:[%s366_s1 + $0x78] sm:$0xff]  }
   0x6   :  { %194 = vmatprep.mubr.bf16.mxu0 %v285_v11  ;;  %v280_v14 = vld [vmem:[%s366_s1 + $0x30] sm:$0xff]   ;;  %v282_v16 = vld [vmem:[%s366_s1 + $0x38] sm:$0xff]   ;;  %v283_v17 = vld [vmem:[%s367_s0] ss:$8 sps:$4 sm:$0xff]  }
   0x7   :  { %248 = vmatpush3.bf16.msra.mxu0 %v270_v3  ;;  %v217_v22 = vld [vmem:[%s368_s2] ss:$0 sm:$0xff] }
   0x8   :  { %249 = vmatprep.subr.bf16.mxu0 %v271_v4 }
   0xb   :  { %250 = vmatpush3.bf16.msra.mxu0 %v272_v5 }
   0xc   :  { %251 = vmatprep.subr.bf16.mxu0 %v273_v6 }
   0xf   :  { %252 = vmatpush3.bf16.msra.mxu0 %v274_v7 }
  0x10   :  { %253 = vmatprep.subr.bf16.mxu0 %v275_v8 }
  0x13   :  { %254 = vmatpush3.bf16.msra.mxu0 %v276_v9 }
  0x14   :  { %255 = vmatprep.subr.bf16.mxu0 %v277_v10 }
  0x17   :  { %256 = vmatpush3.bf16.msra.mxu0 %v278_v12 }
  0x18   :  { %257 = vmatprep.subr.bf16.mxu0 %v279_v13 }
  0x1b   :  { %258 = vmatpush3.bf16.msra.mxu0 %v280_v14 }
  0x1c   :  { %259 = vmatprep.subr.bf16.mxu0 %v281_v15 }
  0x1f   :  { %260 = vmatpush3.bf16.msra.mxu0 %v282_v16 }
  0x22   :  { %195 = vmatmul.mubr.bf16.vlgmr.msra.gmra.mrb[0].mxu0 %v283_v17 }
  0xf5   :  { %v261_v18 = vpop.f32.mrb[0].mxu0 }
  0xf6   :  { %v262_v19 = vpop.f32.mrb[1].mxu0 }
  0xf7   :  { %v263_v20 = vadd.f32 %v262_v19, %v261_v18  ;;  %v264_v21 = vpop.f32.mrb[2].mxu0 }
  0xf8   :  { %v265_v23 = vpop.f32.mrb[3].mxu0 }
  0xf9   :  { %v266_v24 = vadd.f32 %v265_v23, %v264_v21  ;;  %v197_v25 = vadd.f32 %v263_v20, %v217_v22 }
  0xfb   :  { %v200_v26 = vadd.f32 %v266_v24, %v217_v22 }
  0xfd   :  { %v243_v27 = vpack.c.bf16 %v200_v26, %v197_v25 }
  0xff   :  { %244 = vst [vmem:[%s369_s3] sm:$0xff] %v243_v27  }

</bundles_post_ra>
